<compile_context>
chip_gen: v6e
topology: v6e:2x2x1
jax: 0.10.0
libtpu: 0.0.40
codegen_flags: <defaults>
</compile_context>

<pallas_src>
import jax
import jax.numpy as jnp
from jax import lax
from jax.experimental import pallas as pl
from jax.experimental.pallas import tpu as pltpu


def _round_up(x, m):
    return ((x + m - 1) // m) * m


def lr_probe_kernel(x_ref, w_ref, o_ref):
    # x_ref: (TN, D)  w_ref: (1, D)  o_ref: (1, TN)   -- lane-dense output
    logits = lax.dot_general(
        w_ref[...], x_ref[...],
        dimension_numbers=(((1,), (1,)), ((), ())),
        preferred_element_type=jnp.float32,
    )  # (1, TN)
    o_ref[...] = jax.nn.sigmoid(logits).astype(o_ref.dtype)


def lr_probe_forward(x, w, *, tn=None):
    """Pallas equivalent of LRProbe.forward: sigmoid(x @ w.T).squeeze(-1)."""
    N, D = x.shape
    assert w.shape == (1, D)

    itemsize = jnp.dtype(x.dtype).itemsize
    D_pad = _round_up(D, 128)

    if tn is None:
        # Double-buffered x tile must fit a conservative scoped-VMEM budget (v5e/v7x safe).
        vmem_budget = 12 * 1024 * 1024
        tn = (vmem_budget // (2 * D_pad * itemsize)) // 128 * 128
        tn = int(max(128, min(1024, tn)))
        # Don't over-pad tiny batches.
        tn = min(tn, _round_up(N, 128))
        # Prefer >= 2 grid steps so v7x's second TensorCore gets work.
        if N > 128:
            tn = max(128, min(tn, _round_up(pl.cdiv(N, 2), 128)))
    assert tn % 128 == 0, "tn must be a multiple of 128 (lane-dense output tiles)"

    N_pad = _round_up(N, tn)
    num_blocks = N_pad // tn

    # Wrapper-side padding (zeros): padded D columns contribute 0 to the dot;
    # padded N rows produce sigmoid(0)=0.5 and are sliced off below.
    if N_pad != N or D_pad != D:
        x_p = jnp.pad(x, ((0, N_pad - N), (0, D_pad - D)))
    else:
        x_p = x
    w_p = jnp.pad(w, ((0, 0), (0, D_pad - D))) if D_pad != D else w
    w_p = w_p.astype(x_p.dtype)

    out = pl.pallas_call(
        lr_probe_kernel,
        out_shape=jax.ShapeDtypeStruct((1, N_pad), x.dtype),
        grid_spec=pltpu.PrefetchScalarGridSpec(
            num_scalar_prefetch=0,
            grid=(num_blocks,),
            in_specs=[
                pl.BlockSpec((tn, D_pad), lambda i: (i, 0)),
                pl.BlockSpec((1, D_pad), lambda i: (0, 0)),
            ],
            out_specs=pl.BlockSpec((1, tn), lambda i: (0, i)),
        ),
        compiler_params=pltpu.CompilerParams(
            dimension_semantics=("parallel",),
        ),
        cost_estimate=pl.CostEstimate(
            flops=2 * N_pad * D_pad,
            transcendentals=N_pad,
            bytes_accessed=N_pad * D_pad * itemsize + D_pad * itemsize + N_pad * itemsize,
        ),
    )(x_p, w_p)

    # squeeze(-1) + drop padding rows: (1, N_pad) -> (N,)
    return out[0, :N]


if __name__ == "__main__":
    key = jax.random.PRNGKey(0)
    k_x, k_w, k_x2, k_w2 = jax.random.split(key, 4)

    # Small-shape test consistent with the module: batch=8, d_in=32.
    N, D = 8, 32
    x = jax.random.normal(k_x, (N, D), dtype=jnp.float32)
    bound = 1.0 / jnp.sqrt(jnp.float32(D))
    w = jax.random.uniform(k_w, (1, D), dtype=jnp.float32, minval=-bound, maxval=bound)

    y = lr_probe_forward(x, w)
    y = jax.block_until_ready(y)
    y_ref = jax.nn.sigmoid(x @ w.T)[:, 0]
    assert y.shape == (N,)
    assert jnp.allclose(y, y_ref, atol=1e-5, rtol=1e-5), (y, y_ref)

    # Second test: unaligned shapes exercising padding + multi-block grid.
    N2, D2 = 300, 200
    x2 = jax.random.normal(k_x2, (N2, D2), dtype=jnp.float32)
    bound2 = 1.0 / jnp.sqrt(jnp.float32(D2))
    w2 = jax.random.uniform(k_w2, (1, D2), dtype=jnp.float32, minval=-bound2, maxval=bound2)

    y2 = lr_probe_forward(x2, w2)
    y2 = jax.block_until_ready(y2)
    y2_ref = jax.nn.sigmoid(x2 @ w2.T)[:, 0]
    assert y2.shape == (N2,)
    assert jnp.allclose(y2, y2_ref, atol=1e-5, rtol=1e-5)

    print("KERNEL_OK")
</pallas_src>

<mosaic_0001>
module attributes {stable_mosaic.version = 11 : i64} {
  func.func @lr_probe_kernel(%arg0: i32, %arg1: memref<128x128xf32, #tpu.memory_space<vmem>>, %arg2: memref<1x128xf32, #tpu.memory_space<vmem>>, %arg3: memref<1x128xf32, #tpu.memory_space<vmem>>) attributes {dimension_semantics = [#tpu.dimension_semantics<parallel>], iteration_bounds = array<i64: 1>, scalar_prefetch = 0 : i64, scratch_operands = 0 : i64, tpu.core_type = #tpu.core_type<tc>, window_params = [{transform_indices = @transform_0, window_bounds = array<i64: 128, 128>}, {pipeline_mode = #tpu.pipeline_mode<synchronous>, transform_indices = @transform_1, window_bounds = array<i64: 1, 128>}, {transform_indices = @transform_2, window_bounds = array<i64: 1, 128>}]} {
    %c0 = arith.constant 0 : index
    %c0_0 = arith.constant 0 : index
    %0 = vector.load %arg2[%c0, %c0_0] : memref<1x128xf32, #tpu.memory_space<vmem>>, vector<1x128xf32>
    %c0_1 = arith.constant 0 : index
    %c0_2 = arith.constant 0 : index
    %1 = vector.load %arg1[%c0_1, %c0_2] : memref<128x128xf32, #tpu.memory_space<vmem>>, vector<128x128xf32>
    %cst = arith.constant dense<0.000000e+00> : vector<1x128xf32>
    %2 = tpu.matmul %0, %1, %cst {dimension_numbers = #tpu.dot_dimension_numbers<[1], [1], [0], [0], [0, 0, 1, 0], [], []>} : vector<1x128xf32>, vector<128x128xf32>, vector<1x128xf32> -> vector<1x128xf32>
    %3 = arith.negf %2 : vector<1x128xf32>
    %4 = math.exp %3 : vector<1x128xf32>
    %cst_3 = arith.constant 1.000000e+00 : f32
    %5 = vector.broadcast %cst_3 : f32 to vector<1x128xf32>
    %6 = arith.addf %5, %4 : vector<1x128xf32>
    %7 = arith.divf %5, %6 : vector<1x128xf32>
    %c0_4 = arith.constant 0 : index
    %c0_5 = arith.constant 0 : index
    %8 = vector.load %arg3[%c0_4, %c0_5] : memref<1x128xf32, #tpu.memory_space<vmem>>, vector<1x128xf32>
    tpu.vector_store %arg3[%c0_4, %c0_5], %7 {strides = array<i32>} : memref<1x128xf32, #tpu.memory_space<vmem>>, vector<1x128xf32>,
    return
  }
  func.func @transform_0(%arg0: i32) -> (i32, i32) {
    %c0_i32 = arith.constant 0 : i32
    %c0_i32_0 = arith.constant 0 : i32
    return %arg0, %c0_i32 : i32, i32
  }
  func.func @transform_1(%arg0: i32) -> (i32, i32) {
    %c0_i32 = arith.constant 0 : i32
    %c0_i32_0 = arith.constant 0 : i32
    %c0_i32_1 = arith.constant 0 : i32
    return %c0_i32, %c0_i32_0 : i32, i32
  }
  func.func @transform_2(%arg0: i32) -> (i32, i32) {
    %c0_i32 = arith.constant 0 : i32
    %c0_i32_0 = arith.constant 0 : i32
    return %c0_i32, %arg0 : i32, i32
  }
}

</mosaic_0001>

<bundles_post_ra>
// kernel: tpu_custom_call.1
= control target key start
LH: loop header
LB: loop body
LE: loop exit
PB: predicated region body
PF: predicated region fallthrough
CT: control target
= control target key end

     0   :  { %7 = vsyncpa [#allocation3], 0  ;;  %s272_s0 = inlined_call_operand.hbm [shape: f32[128,128], index: 0, kind: input, shape index: {}]   ;;  %s273_s1 = inlined_call_operand.vmem [shape: f32[1,128], index: 1, kind: input, shape index: {}]   ;;  %s274_s2 = inlined_call_operand.hbm [shape: f32[1,128], index: 2, kind: output, shape index: {}]  }
   0x1   :  { %8 = vsyncpa [#allocation4], 0  ;;  %s242_s9 = smov [#allocation2]  }
   0x2   :  { %s14_s10 = sshll.u32 %s242_s9, 4  ;;  %s15_s10 = int_to_ptr.vmem [resolvable:$true] %s14_s10 }
   0x3   :  { %s206_s11 = scalar_lea.vmem %s15_s10, 2048  ;;  %p211_p1 = scmp.lt.s32.totalorder %s15_s10, %s15_s10 }
   0x4   :  { %p207_p0 = scmp.ne.s32.totalorder %s15_s10, %s206_s11  ;;  %p212_p2 = scmp.lt.s32.totalorder %s206_s11, %s206_s11 }
   0x6   :  { %p213_p3 = por %p212_p2, %p211_p1 }
   0x8   :  { %p214_p4 = pnand %p213_p3, %p207_p0 }
   0xa   :  { %217 = shalt.err (!%p214_p4)
}
   0xb   :  { %s243_s12 = smov 128   ;;  %s244_s13 = smov 8  }
   0xc   :  { %20 = dma.hbm_to_vmem [thread:$0]  %s272_s0, 2048, %s15_s10, [#allocation3], %s243_s12, %s243_s12, %s244_s13  }
   0xd   :  { %238 = dma.done.wait [#allocation3], 2048  }
   0xe   :  { %239 = vsyncadd [#allocation3], 4294965248  ;;  %v245_v0 = vmov 0.0   ;;  %vm246_vm0 = vmmov 0   ;;  %v42_v1 = vld [vmem:[#allocation2 + $0x78] sm:$0xff]  ;;  %v41_v2 = vld [vmem:[#allocation2 + $0x70] sm:$0xff] }
   0xf   :  { %153 = vmatprep.subr.mxu0 %v245_v0  ;;  %185 = vmatprep.mubr.msk.f32.mxu0 %vm246_vm0, %v245_v0  ;;  %v40_v3 = vld [vmem:[#allocation2 + $0x68] sm:$0xff]  ;;  %v39_v4 = vld [vmem:[#allocation2 + $0x60] sm:$0xff]  ;;  %v38_v5 = vld [vmem:[#allocation2 + $0x58] sm:$0xff]  ;;  %s247_s17 = smov [#allocation5]  }
  0x10   :  { %154 = vmatpush3.xpose.msra.mxu0 %v42_v1  ;;  %v37_v6 = vld [vmem:[#allocation2 + $0x50] sm:$0xff]  ;;  %v36_v7 = vld [vmem:[#allocation2 + $0x48] sm:$0xff]  ;;  %v35_v8 = vld [vmem:[#allocation2 + $0x40] sm:$0xff]  ;;  %s126_s18 = sshll.u32 %s247_s17, 4  ;;  %s127_s18 = int_to_ptr.vmem [resolvable:$true] %s126_s18 }
  0x11   :  { %155 = vmatprep.subr.mxu0 %v245_v0  ;;  %v34_v9 = vld [vmem:[#allocation2 + $0x38] sm:$0xff]  ;;  %v33_v10 = vld [vmem:[#allocation2 + $0x30] sm:$0xff]  ;;  %v32_v11 = vld [vmem:[#allocation2 + $0x28] sm:$0xff]  ;;  %s218_s19 = scalar_lea.vmem %s127_s18, 16  ;;  %s222_s20 = scalar_lea.vmem %s127_s18, 32 }
  0x12   :  { %v31_v12 = vld [vmem:[#allocation2 + $0x20] sm:$0xff]  ;;  %v30_v13 = vld [vmem:[#allocation2 + $0x18] sm:$0xff]  ;;  %v29_v14 = vld [vmem:[#allocation2 + $0x10] sm:$0xff]  ;;  %p219_p5 = scmp.ne.s32.totalorder %s127_s18, %s218_s19  ;;  %p223_p6 = scmp.lt.s32.totalorder %s127_s18, %s127_s18 }
  0x13   :  { %v28_v15 = vld [vmem:[#allocation2 + $0x8] sm:$0xff]  ;;  %v27_v16 = vld [vmem:[#allocation2] sm:$0xff]  ;;  %p224_p7 = scmp.lt.s32.totalorder %s222_s20, %s218_s19 }
  0x14   :  { %156 = vmatpush3.xpose.msra.mxu0 %v41_v2  ;;  %v26_v17 = vld [vmem:[%s273_s1] sm:$0x1] }
  0x15   :  { %157 = vmatprep.subr.mxu0 %v245_v0  ;;  %p225_p8 = por %p224_p7, %p223_p6 }
  0x17   :  { %p226_p9 = pnand %p225_p8, %p219_p5 }
  0x18   :  { %158 = vmatpush3.xpose.msra.mxu0 %v40_v3 }
  0x19   :  { %159 = vmatprep.subr.mxu0 %v245_v0 }
  0x1c   :  { %160 = vmatpush3.xpose.msra.mxu0 %v39_v4 }
  0x1d   :  { %161 = vmatprep.subr.mxu0 %v245_v0 }
  0x20   :  { %162 = vmatpush3.xpose.msra.mxu0 %v38_v5 }
  0x21   :  { %163 = vmatprep.subr.mxu0 %v245_v0 }
  0x24   :  { %164 = vmatpush3.xpose.msra.mxu0 %v37_v6 }
  0x25   :  { %165 = vmatprep.subr.mxu0 %v245_v0 }
  0x28   :  { %166 = vmatpush3.xpose.msra.mxu0 %v36_v7 }
  0x29   :  { %167 = vmatprep.subr.mxu0 %v245_v0 }
  0x2c   :  { %168 = vmatpush3.xpose.msra.mxu0 %v35_v8 }
  0x2d   :  { %169 = vmatprep.subr.mxu0 %v245_v0 }
  0x30   :  { %170 = vmatpush3.xpose.msra.mxu0 %v34_v9 }
  0x31   :  { %171 = vmatprep.subr.mxu0 %v245_v0 }
  0x34   :  { %172 = vmatpush3.xpose.msra.mxu0 %v33_v10 }
  0x35   :  { %173 = vmatprep.subr.mxu0 %v245_v0 }
  0x38   :  { %174 = vmatpush3.xpose.msra.mxu0 %v32_v11 }
  0x39   :  { %175 = vmatprep.subr.mxu0 %v245_v0 }
  0x3c   :  { %176 = vmatpush3.xpose.msra.mxu0 %v31_v12 }
  0x3d   :  { %177 = vmatprep.subr.mxu0 %v245_v0 }
  0x40   :  { %178 = vmatpush3.xpose.msra.mxu0 %v30_v13 }
  0x41   :  { %179 = vmatprep.subr.mxu0 %v245_v0 }
  0x44   :  { %180 = vmatpush3.xpose.msra.mxu0 %v29_v14 }
  0x45   :  { %181 = vmatprep.subr.mxu0 %v245_v0 }
  0x48   :  { %182 = vmatpush3.xpose.msra.mxu0 %v28_v15 }
  0x49   :  { %183 = vmatprep.subr.mxu0 %v245_v0 }
  0x4c   :  { %184 = vmatpush3.xpose.msra.mxu0 %v27_v16 }
  0x4f   :  { %186 = vmatmul.mubr.f32.vlgmr.msra.gmra.mxu0 %v26_v17 }
 0x10f   :  { %v109_v18 = vpop.f32.mrf.mxu0 }
 0x110   :  { %v135_v19 = vmul.f32 -1.442695, %v109_v18 }
 0x111   :  { %v187_v20 = vpop.f32.mrf.mxu0 }
 0x112   :  { %194 = vpow2.f32 %v135_v19 }
 0x11f   :  { %v195_v21 = vpop.eup %194 }
 0x120   :  { %v116_v22 = vadd.f32 1.0, %v195_v21 }
 0x122   :  { %196 = vrcp.f32 %v116_v22 }
 0x12f   :  { %v197_v23 = vpop.eup %196 }
 0x130   :  { %119 = vst [vmem:[#allocation5] sm:$0x1] %v197_v23 }
 0x131   :  { %229 = shalt.err (!%p226_p9)
}
 0x132   :  { %129 = dma.vmem_to_hbm [thread:$0]  %s127_s18, 16, %s274_s2, [#allocation4]  }
 0x133   :  { %240 = dma.done.wait [#allocation4], 16  }
 0x134   :  { %241 = vsyncadd [#allocation4], 4294967280 }
 0x135   :  { %133 = vsyncpa [#allocation3], 1 }
 0x136   :  { %134 = vsyncpa [#allocation4], 1 }

</bundles_post_ra>
